<compile_context>
chip_gen: v5e
topology: v5e:2x2
jax: 0.10.0
libtpu: 0.0.40
codegen_flags: <defaults>
</compile_context>

<pallas_src>
import functools

import jax
import jax.numpy as jnp
import numpy as np
from jax.experimental import pallas as pl
from jax.experimental.pallas import tpu as pltpu


def _deep_hed_loss_kernel(*refs, tile_r, total_r, seg_weight, edge_weight,
                          pos_weight, n_edge):
    """One grid step = one row-tile of the collapsed (rows, cols) pixel view.

    refs = (seg_pred, edge_0..edge_{n_edge-1}, seg_t, edge_t, out)
      pred / target refs : (TR, C) blocks (any float dtype; cast in-kernel)
      out                : (1, 1, 128) f32 per-step weighted partial loss sum
    """
    seg_p = refs[0]
    edge_p = refs[1:1 + n_edge]
    seg_t_ref = refs[1 + n_edge]
    edge_t_ref = refs[2 + n_edge]
    out_ref = refs[3 + n_edge]

    g = pl.program_id(0)

    ts = seg_t_ref[...].astype(jnp.float32)
    te = edge_t_ref[...].astype(jnp.float32)

    def wbce(x_ref, t, pw):
        x = x_ref[...].astype(jnp.float32)
        max_val = jnp.maximum(-x, jnp.float32(0.0))
        softplus = jnp.log1p(jnp.exp(-jnp.abs(x)))   # log1p for torch parity
        zlp = softplus + max_val
        if pw == 1.0:                                 # plain BCE-with-logits
            return (1.0 - t) * x + zlp
        return (1.0 - t) * x + (1.0 + (pw - 1.0) * t) * zlp

    # Seg map (pos_weight = 1).
    acc = wbce(seg_p, ts, 1.0)
    if seg_weight != 1.0:
        acc = acc * jnp.float32(seg_weight)

    # Edge maps (pos_weight = 0.96), unrolled at trace time.
    edge_acc = None
    for e_ref in edge_p:
        l = wbce(e_ref, te, pos_weight)
        edge_acc = l if edge_acc is None else edge_acc + l
    if edge_acc is not None:
        if edge_weight != 1.0:
            edge_acc = edge_acc * jnp.float32(edge_weight)
        acc = acc + edge_acc

    # Mask rows past the logical extent (ragged last block).  Select, not
    # multiply: OOB tail may hold arbitrary (even NaN/Inf) garbage.
    row = jax.lax.broadcasted_iota(jnp.int32, (acc.shape[0], 1), 0)
    valid = (g * tile_r + row) < total_r
    acc = jnp.where(valid, acc, jnp.float32(0.0))

    out_ref[...] = jnp.full(out_ref.shape, jnp.sum(acc), dtype=out_ref.dtype)


def _round_up(x, m):
    return -(-x // m) * m


def _pick_row_tile(rows, cols, n_arrays):
    """Row tile: multiple of 8 sublanes, ~8 MiB of inputs per pipeline step,
    capped so the grid has >= 2 steps whenever possible (v7x megacore)."""
    if rows <= 8:
        return rows                                   # single full-extent block
    step_budget = 8 * 1024 * 1024                     # input bytes per grid step
    tr = max(8, (step_budget // (n_arrays * 4 * cols)) // 8 * 8)
    if rows >= 16:
        tr = min(tr, max(8, _round_up(pl.cdiv(rows, 2), 8)))
    tr = min(tr, _round_up(rows, 8))
    if tr >= rows:
        return rows
    return tr


def deep_hed_fcn2s_loss(inputs, targets, seg_weight=1.0, edge_weight=1.0,
                        pos_weight=0.96):
    """JAX wrapper mirroring DeepHEDFCN2sLoss.forward.

    inputs  = (seg_pred, [edge_pred_0, ..., edge_pred_{K-1}]) each (N, 1, H, W)
    targets = (seg_targets, edge_targets)                     each (N, 1, H, W)
    """
    seg_pred, edge_preds = inputs
    seg_targets, edge_targets = targets
    edge_preds = list(edge_preds)
    n_edge = len(edge_preds)

    def as2d(x):
        # Collapse leading dims, keep the (lane) minor dim: zero-copy when the
        # collapsed row count is layout-compatible; never a 7-map stack copy.
        return x.reshape(-1, x.shape[-1])

    arrays = ([as2d(seg_pred)] + [as2d(p) for p in edge_preds]
              + [as2d(seg_targets), as2d(edge_targets)])
    rows, cols = arrays[0].shape
    m = rows * cols                                   # elements per (squeezed) map

    tr = _pick_row_tile(rows, cols, len(arrays))
    grid = pl.cdiv(rows, tr)

    try:
        vmem_cap = int(pltpu.get_tpu_info().vmem_capacity_bytes)
    except Exception:
        vmem_cap = 64 * 1024 * 1024
    vmem_limit = min(64 * 1024 * 1024, vmem_cap * 3 // 4)

    bytes_in = sum(int(np.prod(a.shape)) * a.dtype.itemsize for a in arrays)
    cost = pl.CostEstimate(
        flops=int(9 * (n_edge + 1) * m),
        transcendentals=int(2 * (n_edge + 1) * m),    # exp + log1p per map
        bytes_accessed=int(bytes_in + grid * 128 * 4))

    kernel = functools.partial(
        _deep_hed_loss_kernel,
        tile_r=int(tr), total_r=int(rows),
        seg_weight=float(seg_weight), edge_weight=float(edge_weight),
        pos_weight=float(pos_weight), n_edge=n_edge)

    in_specs = [pl.BlockSpec((tr, cols), lambda g: (g, 0)) for _ in arrays]

    partials = pl.pallas_call(
        kernel,
        out_shape=jax.ShapeDtypeStruct((grid, 1, 128), jnp.float32),
        grid_spec=pltpu.PrefetchScalarGridSpec(
            num_scalar_prefetch=0,
            grid=(grid,),
            in_specs=in_specs,
            out_specs=pl.BlockSpec((1, 1, 128), lambda g: (g, 0, 0)),
        ),
        compiler_params=pltpu.CompilerParams(
            dimension_semantics=("parallel",),        # independent partial sums
            vmem_limit_bytes=int(vmem_limit)),
        cost_estimate=cost,
    )(*arrays)

    # Each per-map loss is a mean over m elements; weights were applied in-kernel.
    return jnp.sum(partials[:, 0, 0]) / jnp.float32(m)


# -------------------- pure-JAX reference (mirrors the PyTorch module) --------

def _wbce_ref(logits, targets, pos_weight):
    logits = logits.astype(jnp.float32)
    targets = targets.astype(jnp.float32)
    max_val = jnp.maximum(-logits, 0.0)
    log_weight = 1.0 + (pos_weight - 1.0) * targets
    loss = (1.0 - targets) * logits + log_weight * (
        jnp.log1p(jnp.exp(-jnp.abs(logits))) + max_val)
    return jnp.mean(loss)


def deep_hed_fcn2s_loss_ref(inputs, targets, seg_weight=1.0, edge_weight=1.0):
    seg_pred, edge_preds = inputs
    seg_targets, edge_targets = targets
    seg_loss = _wbce_ref(jnp.squeeze(seg_pred), jnp.squeeze(seg_targets), 1.0)
    edge_loss = jnp.float32(0.0)
    for p in edge_preds:
        edge_loss = edge_loss + _wbce_ref(jnp.squeeze(p),
                                          jnp.squeeze(edge_targets), 0.96)
    return seg_weight * seg_loss + edge_weight * edge_loss


if __name__ == "__main__":
    key = jax.random.PRNGKey(0)

    def make_case(case_key, shape, pred_dtype):
        ks = jax.random.split(case_key, 9)
        seg_pred = jax.random.normal(ks[0], shape,
                                     dtype=jnp.float32).astype(pred_dtype)
        edge_preds = [jax.random.normal(ks[1 + i], shape,
                                        dtype=jnp.float32).astype(pred_dtype)
                      for i in range(6)]
        seg_t = jax.random.bernoulli(ks[7], 0.3, shape).astype(jnp.float32)
        edge_t = jax.random.bernoulli(ks[8], 0.1, shape).astype(jnp.float32)
        return (seg_pred, edge_preds), (seg_t, edge_t)

    k1, k2 = jax.random.split(key)
    cases = [
        # f32 logits, evenly tiled rows (grid of 2).
        (make_case(k1, (2, 1, 16, 16), jnp.float32), 1e-5),
        # bf16 logits (cast to f32 in-kernel) + ragged last row-block.
        (make_case(k2, (1, 1, 20, 24), jnp.bfloat16), 1e-4),
    ]

    for (inputs, targets), tol in cases:
        loss = deep_hed_fcn2s_loss(inputs, targets)
        jax.block_until_ready(loss)
        ref = deep_hed_fcn2s_loss_ref(inputs, targets)
        np.testing.assert_allclose(np.asarray(loss), np.asarray(ref),
                                   rtol=tol, atol=tol)

    print("KERNEL_OK")
</pallas_src>

<mosaic_0001>
module attributes {stable_mosaic.version = 11 : i64} {
  func.func @_deep_hed_loss_kernel(%arg0: i32, %arg1: memref<16x16xf32, #tpu.memory_space<vmem>>, %arg2: memref<16x16xf32, #tpu.memory_space<vmem>>, %arg3: memref<16x16xf32, #tpu.memory_space<vmem>>, %arg4: memref<16x16xf32, #tpu.memory_space<vmem>>, %arg5: memref<16x16xf32, #tpu.memory_space<vmem>>, %arg6: memref<16x16xf32, #tpu.memory_space<vmem>>, %arg7: memref<16x16xf32, #tpu.memory_space<vmem>>, %arg8: memref<16x16xf32, #tpu.memory_space<vmem>>, %arg9: memref<16x16xf32, #tpu.memory_space<vmem>>, %arg10: memref<1x1x128xf32, #tpu.memory_space<vmem>>) attributes {dimension_semantics = [#tpu.dimension_semantics<parallel>], iteration_bounds = array<i64: 2>, scalar_prefetch = 0 : i64, scratch_operands = 0 : i64, tpu.core_type = #tpu.core_type<tc>, window_params = [{transform_indices = @transform_0, window_bounds = array<i64: 16, 16>}, {transform_indices = @transform_1, window_bounds = array<i64: 16, 16>}, {transform_indices = @transform_2, window_bounds = array<i64: 16, 16>}, {transform_indices = @transform_3, window_bounds = array<i64: 16, 16>}, {transform_indices = @transform_4, window_bounds = array<i64: 16, 16>}, {transform_indices = @transform_5, window_bounds = array<i64: 16, 16>}, {transform_indices = @transform_6, window_bounds = array<i64: 16, 16>}, {transform_indices = @transform_7, window_bounds = array<i64: 16, 16>}, {transform_indices = @transform_8, window_bounds = array<i64: 16, 16>}, {transform_indices = @transform_9, window_bounds = array<i64: 1, 1, 128>}]} {
    %c0 = arith.constant 0 : index
    %c0_0 = arith.constant 0 : index
    %0 = vector.load %arg8[%c0, %c0_0] : memref<16x16xf32, #tpu.memory_space<vmem>>, vector<16x16xf32>
    %c0_1 = arith.constant 0 : index
    %c0_2 = arith.constant 0 : index
    %1 = vector.load %arg9[%c0_1, %c0_2] : memref<16x16xf32, #tpu.memory_space<vmem>>, vector<16x16xf32>
    %c0_3 = arith.constant 0 : index
    %c0_4 = arith.constant 0 : index
    %2 = vector.load %arg1[%c0_3, %c0_4] : memref<16x16xf32, #tpu.memory_space<vmem>>, vector<16x16xf32>
    %cst = arith.constant 0.000000e+00 : f32
    %3 = vector.broadcast %cst : f32 to vector<16x16xf32>
    %4 = arith.subf %3, %2 : vector<16x16xf32>
    %cst_5 = arith.constant 0.000000e+00 : f32
    %5 = vector.broadcast %cst_5 : f32 to vector<16x16xf32>
    %6 = arith.maximumf %4, %5 : vector<16x16xf32>
    %7 = math.absf %2 : vector<16x16xf32>
    %cst_6 = arith.constant 0.000000e+00 : f32
    %8 = vector.broadcast %cst_6 : f32 to vector<16x16xf32>
    %9 = arith.subf %8, %7 : vector<16x16xf32>
    %10 = math.exp %9 : vector<16x16xf32>
    %11 = math.log1p %10 : vector<16x16xf32>
    %12 = arith.addf %11, %6 : vector<16x16xf32>
    %cst_7 = arith.constant 1.000000e+00 : f32
    %13 = vector.broadcast %cst_7 : f32 to vector<16x16xf32>
    %14 = arith.subf %13, %0 : vector<16x16xf32>
    %15 = arith.mulf %14, %2 : vector<16x16xf32>
    %16 = arith.addf %15, %12 : vector<16x16xf32>
    %c0_8 = arith.constant 0 : index
    %c0_9 = arith.constant 0 : index
    %17 = vector.load %arg2[%c0_8, %c0_9] : memref<16x16xf32, #tpu.memory_space<vmem>>, vector<16x16xf32>
    %cst_10 = arith.constant 0.000000e+00 : f32
    %18 = vector.broadcast %cst_10 : f32 to vector<16x16xf32>
    %19 = arith.subf %18, %17 : vector<16x16xf32>
    %cst_11 = arith.constant 0.000000e+00 : f32
    %20 = vector.broadcast %cst_11 : f32 to vector<16x16xf32>
    %21 = arith.maximumf %19, %20 : vector<16x16xf32>
    %22 = math.absf %17 : vector<16x16xf32>
    %cst_12 = arith.constant 0.000000e+00 : f32
    %23 = vector.broadcast %cst_12 : f32 to vector<16x16xf32>
    %24 = arith.subf %23, %22 : vector<16x16xf32>
    %25 = math.exp %24 : vector<16x16xf32>
    %26 = math.log1p %25 : vector<16x16xf32>
    %27 = arith.addf %26, %21 : vector<16x16xf32>
    %cst_13 = arith.constant 1.000000e+00 : f32
    %28 = vector.broadcast %cst_13 : f32 to vector<16x16xf32>
    %29 = arith.subf %28, %1 : vector<16x16xf32>
    %30 = arith.mulf %29, %17 : vector<16x16xf32>
    %cst_14 = arith.constant -4.000000e-02 : f32
    %31 = vector.broadcast %cst_14 : f32 to vector<16x16xf32>
    %32 = arith.mulf %31, %1 : vector<16x16xf32>
    %cst_15 = arith.constant 1.000000e+00 : f32
    %33 = vector.broadcast %cst_15 : f32 to vector<16x16xf32>
    %34 = arith.addf %33, %32 : vector<16x16xf32>
    %35 = arith.mulf %34, %27 : vector<16x16xf32>
    %36 = arith.addf %30, %35 : vector<16x16xf32>
    %c0_16 = arith.constant 0 : index
    %c0_17 = arith.constant 0 : index
    %37 = vector.load %arg3[%c0_16, %c0_17] : memref<16x16xf32, #tpu.memory_space<vmem>>, vector<16x16xf32>
    %cst_18 = arith.constant 0.000000e+00 : f32
    %38 = vector.broadcast %cst_18 : f32 to vector<16x16xf32>
    %39 = arith.subf %38, %37 : vector<16x16xf32>
    %cst_19 = arith.constant 0.000000e+00 : f32
    %40 = vector.broadcast %cst_19 : f32 to vector<16x16xf32>
    %41 = arith.maximumf %39, %40 : vector<16x16xf32>
    %42 = math.absf %37 : vector<16x16xf32>
    %cst_20 = arith.constant 0.000000e+00 : f32
    %43 = vector.broadcast %cst_20 : f32 to vector<16x16xf32>
    %44 = arith.subf %43, %42 : vector<16x16xf32>
    %45 = math.exp %44 : vector<16x16xf32>
    %46 = math.log1p %45 : vector<16x16xf32>
    %47 = arith.addf %46, %41 : vector<16x16xf32>
    %cst_21 = arith.constant 1.000000e+00 : f32
    %48 = vector.broadcast %cst_21 : f32 to vector<16x16xf32>
    %49 = arith.subf %48, %1 : vector<16x16xf32>
    %50 = arith.mulf %49, %37 : vector<16x16xf32>
    %cst_22 = arith.constant -4.000000e-02 : f32
    %51 = vector.broadcast %cst_22 : f32 to vector<16x16xf32>
    %52 = arith.mulf %51, %1 : vector<16x16xf32>
    %cst_23 = arith.constant 1.000000e+00 : f32
    %53 = vector.broadcast %cst_23 : f32 to vector<16x16xf32>
    %54 = arith.addf %53, %52 : vector<16x16xf32>
    %55 = arith.mulf %54, %47 : vector<16x16xf32>
    %56 = arith.addf %50, %55 : vector<16x16xf32>
    %57 = arith.addf %36, %56 : vector<16x16xf32>
    %c0_24 = arith.constant 0 : index
    %c0_25 = arith.constant 0 : index
    %58 = vector.load %arg4[%c0_24, %c0_25] : memref<16x16xf32, #tpu.memory_space<vmem>>, vector<16x16xf32>
    %cst_26 = arith.constant 0.000000e+00 : f32
    %59 = vector.broadcast %cst_26 : f32 to vector<16x16xf32>
    %60 = arith.subf %59, %58 : vector<16x16xf32>
    %cst_27 = arith.constant 0.000000e+00 : f32
    %61 = vector.broadcast %cst_27 : f32 to vector<16x16xf32>
    %62 = arith.maximumf %60, %61 : vector<16x16xf32>
    %63 = math.absf %58 : vector<16x16xf32>
    %cst_28 = arith.constant 0.000000e+00 : f32
    %64 = vector.broadcast %cst_28 : f32 to vector<16x16xf32>
    %65 = arith.subf %64, %63 : vector<16x16xf32>
    %66 = math.exp %65 : vector<16x16xf32>
    %67 = math.log1p %66 : vector<16x16xf32>
    %68 = arith.addf %67, %62 : vector<16x16xf32>
    %cst_29 = arith.constant 1.000000e+00 : f32
    %69 = vector.broadcast %cst_29 : f32 to vector<16x16xf32>
    %70 = arith.subf %69, %1 : vector<16x16xf32>
    %71 = arith.mulf %70, %58 : vector<16x16xf32>
    %cst_30 = arith.constant -4.000000e-02 : f32
    %72 = vector.broadcast %cst_30 : f32 to vector<16x16xf32>
    %73 = arith.mulf %72, %1 : vector<16x16xf32>
    %cst_31 = arith.constant 1.000000e+00 : f32
    %74 = vector.broadcast %cst_31 : f32 to vector<16x16xf32>
    %75 = arith.addf %74, %73 : vector<16x16xf32>
    %76 = arith.mulf %75, %68 : vector<16x16xf32>
    %77 = arith.addf %71, %76 : vector<16x16xf32>
    %78 = arith.addf %57, %77 : vector<16x16xf32>
    %c0_32 = arith.constant 0 : index
    %c0_33 = arith.constant 0 : index
    %79 = vector.load %arg5[%c0_32, %c0_33] : memref<16x16xf32, #tpu.memory_space<vmem>>, vector<16x16xf32>
    %cst_34 = arith.constant 0.000000e+00 : f32
    %80 = vector.broadcast %cst_34 : f32 to vector<16x16xf32>
    %81 = arith.subf %80, %79 : vector<16x16xf32>
    %cst_35 = arith.constant 0.000000e+00 : f32
    %82 = vector.broadcast %cst_35 : f32 to vector<16x16xf32>
    %83 = arith.maximumf %81, %82 : vector<16x16xf32>
    %84 = math.absf %79 : vector<16x16xf32>
    %cst_36 = arith.constant 0.000000e+00 : f32
    %85 = vector.broadcast %cst_36 : f32 to vector<16x16xf32>
    %86 = arith.subf %85, %84 : vector<16x16xf32>
    %87 = math.exp %86 : vector<16x16xf32>
    %88 = math.log1p %87 : vector<16x16xf32>
    %89 = arith.addf %88, %83 : vector<16x16xf32>
    %cst_37 = arith.constant 1.000000e+00 : f32
    %90 = vector.broadcast %cst_37 : f32 to vector<16x16xf32>
    %91 = arith.subf %90, %1 : vector<16x16xf32>
    %92 = arith.mulf %91, %79 : vector<16x16xf32>
    %cst_38 = arith.constant -4.000000e-02 : f32
    %93 = vector.broadcast %cst_38 : f32 to vector<16x16xf32>
    %94 = arith.mulf %93, %1 : vector<16x16xf32>
    %cst_39 = arith.constant 1.000000e+00 : f32
    %95 = vector.broadcast %cst_39 : f32 to vector<16x16xf32>
    %96 = arith.addf %95, %94 : vector<16x16xf32>
    %97 = arith.mulf %96, %89 : vector<16x16xf32>
    %98 = arith.addf %92, %97 : vector<16x16xf32>
    %99 = arith.addf %78, %98 : vector<16x16xf32>
    %c0_40 = arith.constant 0 : index
    %c0_41 = arith.constant 0 : index
    %100 = vector.load %arg6[%c0_40, %c0_41] : memref<16x16xf32, #tpu.memory_space<vmem>>, vector<16x16xf32>
    %cst_42 = arith.constant 0.000000e+00 : f32
    %101 = vector.broadcast %cst_42 : f32 to vector<16x16xf32>
    %102 = arith.subf %101, %100 : vector<16x16xf32>
    %cst_43 = arith.constant 0.000000e+00 : f32
    %103 = vector.broadcast %cst_43 : f32 to vector<16x16xf32>
    %104 = arith.maximumf %102, %103 : vector<16x16xf32>
    %105 = math.absf %100 : vector<16x16xf32>
    %cst_44 = arith.constant 0.000000e+00 : f32
    %106 = vector.broadcast %cst_44 : f32 to vector<16x16xf32>
    %107 = arith.subf %106, %105 : vector<16x16xf32>
    %108 = math.exp %107 : vector<16x16xf32>
    %109 = math.log1p %108 : vector<16x16xf32>
    %110 = arith.addf %109, %104 : vector<16x16xf32>
    %cst_45 = arith.constant 1.000000e+00 : f32
    %111 = vector.broadcast %cst_45 : f32 to vector<16x16xf32>
    %112 = arith.subf %111, %1 : vector<16x16xf32>
    %113 = arith.mulf %112, %100 : vector<16x16xf32>
    %cst_46 = arith.constant -4.000000e-02 : f32
    %114 = vector.broadcast %cst_46 : f32 to vector<16x16xf32>
    %115 = arith.mulf %114, %1 : vector<16x16xf32>
    %cst_47 = arith.constant 1.000000e+00 : f32
    %116 = vector.broadcast %cst_47 : f32 to vector<16x16xf32>
    %117 = arith.addf %116, %115 : vector<16x16xf32>
    %118 = arith.mulf %117, %110 : vector<16x16xf32>
    %119 = arith.addf %113, %118 : vector<16x16xf32>
    %120 = arith.addf %99, %119 : vector<16x16xf32>
    %c0_48 = arith.constant 0 : index
    %c0_49 = arith.constant 0 : index
    %121 = vector.load %arg7[%c0_48, %c0_49] : memref<16x16xf32, #tpu.memory_space<vmem>>, vector<16x16xf32>
    %cst_50 = arith.constant 0.000000e+00 : f32
    %122 = vector.broadcast %cst_50 : f32 to vector<16x16xf32>
    %123 = arith.subf %122, %121 : vector<16x16xf32>
    %cst_51 = arith.constant 0.000000e+00 : f32
    %124 = vector.broadcast %cst_51 : f32 to vector<16x16xf32>
    %125 = arith.maximumf %123, %124 : vector<16x16xf32>
    %126 = math.absf %121 : vector<16x16xf32>
    %cst_52 = arith.constant 0.000000e+00 : f32
    %127 = vector.broadcast %cst_52 : f32 to vector<16x16xf32>
    %128 = arith.subf %127, %126 : vector<16x16xf32>
    %129 = math.exp %128 : vector<16x16xf32>
    %130 = math.log1p %129 : vector<16x16xf32>
    %131 = arith.addf %130, %125 : vector<16x16xf32>
    %cst_53 = arith.constant 1.000000e+00 : f32
    %132 = vector.broadcast %cst_53 : f32 to vector<16x16xf32>
    %133 = arith.subf %132, %1 : vector<16x16xf32>
    %134 = arith.mulf %133, %121 : vector<16x16xf32>
    %cst_54 = arith.constant -4.000000e-02 : f32
    %135 = vector.broadcast %cst_54 : f32 to vector<16x16xf32>
    %136 = arith.mulf %135, %1 : vector<16x16xf32>
    %cst_55 = arith.constant 1.000000e+00 : f32
    %137 = vector.broadcast %cst_55 : f32 to vector<16x16xf32>
    %138 = arith.addf %137, %136 : vector<16x16xf32>
    %139 = arith.mulf %138, %131 : vector<16x16xf32>
    %140 = arith.addf %134, %139 : vector<16x16xf32>
    %141 = arith.addf %120, %140 : vector<16x16xf32>
    %142 = arith.addf %16, %141 : vector<16x16xf32>
    %143 = tpu.iota {dimensions = array<i32: 0>} : vector<16x1xi32>
    %c16_i32 = arith.constant 16 : i32
    %144 = arith.muli %arg0, %c16_i32 : i32
    %145 = vector.broadcast %144 : i32 to vector<16x1xi32>
    %146 = arith.addi %145, %143 : vector<16x1xi32>
    %c32_i32 = arith.constant 32 : i32
    %147 = vector.broadcast %c32_i32 : i32 to vector<16x1xi32>
    %148 = arith.cmpi slt, %146, %147 : vector<16x1xi32>
    %cst_56 = arith.constant 0.000000e+00 : f32
    %149 = vector.shape_cast %148 : vector<16x1xi1> to vector<16x1xi1>
    %150 = vector.broadcast %149 : vector<16x1xi1> to vector<16x16xi1>
    %151 = vector.broadcast %cst_56 : f32 to vector<16x16xf32>
    %152 = arith.select %150, %142, %151 : vector<16x16xi1>, vector<16x16xf32>
    %153 = vector.shape_cast %152 : vector<16x16xf32> to vector<1x16x16xf32>
    %cst_57 = arith.constant dense<0.000000e+00> : vector<1xf32>
    %154 = vector.multi_reduction <add>, %153, %cst_57 [1, 2] : vector<1x16x16xf32> to vector<1xf32>
    %155 = vector.shape_cast %154 : vector<1xf32> to vector<1x1x1xf32>
    %156 = vector.extract %155[0, 0, 0] : f32 from vector<1x1x1xf32>
    %157 = vector.broadcast %156 : f32 to vector<1x1x128xf32>
    %c0_58 = arith.constant 0 : index
    %c0_59 = arith.constant 0 : index
    %c0_60 = arith.constant 0 : index
    %158 = vector.load %arg10[%c0_58, %c0_59, %c0_60] : memref<1x1x128xf32, #tpu.memory_space<vmem>>, vector<1x1x128xf32>
    tpu.vector_store %arg10[%c0_58, %c0_59, %c0_60], %157 {strides = array<i32>} : memref<1x1x128xf32, #tpu.memory_space<vmem>>, vector<1x1x128xf32>,
    return
  }
  func.func @transform_0(%arg0: i32) -> (i32, i32) {
    %c0_i32 = arith.constant 0 : i32
    %c0_i32_0 = arith.constant 0 : i32
    return %arg0, %c0_i32 : i32, i32
  }
  func.func @transform_1(%arg0: i32) -> (i32, i32) {
    %c0_i32 = arith.constant 0 : i32
    %c0_i32_0 = arith.constant 0 : i32
    return %arg0, %c0_i32 : i32, i32
  }
  func.func @transform_2(%arg0: i32) -> (i32, i32) {
    %c0_i32 = arith.constant 0 : i32
    %c0_i32_0 = arith.constant 0 : i32
    return %arg0, %c0_i32 : i32, i32
  }
  func.func @transform_3(%arg0: i32) -> (i32, i32) {
    %c0_i32 = arith.constant 0 : i32
    %c0_i32_0 = arith.constant 0 : i32
    return %arg0, %c0_i32 : i32, i32
  }
  func.func @transform_4(%arg0: i32) -> (i32, i32) {
    %c0_i32 = arith.constant 0 : i32
    %c0_i32_0 = arith.constant 0 : i32
    return %arg0, %c0_i32 : i32, i32
  }
  func.func @transform_5(%arg0: i32) -> (i32, i32) {
    %c0_i32 = arith.constant 0 : i32
    %c0_i32_0 = arith.constant 0 : i32
    return %arg0, %c0_i32 : i32, i32
  }
  func.func @transform_6(%arg0: i32) -> (i32, i32) {
    %c0_i32 = arith.constant 0 : i32
    %c0_i32_0 = arith.constant 0 : i32
    return %arg0, %c0_i32 : i32, i32
  }
  func.func @transform_7(%arg0: i32) -> (i32, i32) {
    %c0_i32 = arith.constant 0 : i32
    %c0_i32_0 = arith.constant 0 : i32
    return %arg0, %c0_i32 : i32, i32
  }
  func.func @transform_8(%arg0: i32) -> (i32, i32) {
    %c0_i32 = arith.constant 0 : i32
    %c0_i32_0 = arith.constant 0 : i32
    return %arg0, %c0_i32 : i32, i32
  }
  func.func @transform_9(%arg0: i32) -> (i32, i32, i32) {
    %c0_i32 = arith.constant 0 : i32
    %c0_i32_0 = arith.constant 0 : i32
    %c0_i32_1 = arith.constant 0 : i32
    return %arg0, %c0_i32, %c0_i32_0 : i32, i32, i32
  }
}

</mosaic_0001>

<bundles_post_ra>
// kernel: tpu_custom_call.1
= control target key start
LH: loop header
LB: loop body
LE: loop exit
PB: predicated region body
PF: predicated region fallthrough
CT: control target
= control target key end

     0   :  { %s1670_s0 = inlined_call_operand.vmem [shape: f32[32,16], index: 0, kind: input, shape index: {}]   ;;  %s1671_s1 = inlined_call_operand.vmem [shape: f32[32,16], index: 1, kind: input, shape index: {}]   ;;  %s1672_s2 = inlined_call_operand.vmem [shape: f32[32,16], index: 2, kind: input, shape index: {}]   ;;  %s1673_s3 = inlined_call_operand.vmem [shape: f32[32,16], index: 3, kind: input, shape index: {}]   ;;  %s1674_s4 = inlined_call_operand.vmem [shape: f32[32,16], index: 4, kind: input, shape index: {}]   ;;  %s1675_s5 = inlined_call_operand.vmem [shape: f32[32,16], index: 5, kind: input, shape index: {}]   ;;  %s1676_s6 = inlined_call_operand.vmem [shape: f32[32,16], index: 6, kind: input, shape index: {}]   ;;  %s1677_s7 = inlined_call_operand.vmem [shape: f32[32,16], index: 7, kind: input, shape index: {}]   ;;  %s1678_s8 = inlined_call_operand.vmem [shape: f32[32,16], index: 8, kind: input, shape index: {}]   ;;  %s1679_s9 = inlined_call_operand.hbm [shape: f32[2,1,128], index: 9, kind: output, shape index: {}]  }
   0x1   :  { %1680 = sst [smem:[#allocation5_spill]] %s1670_s0 }
   0x2   :  { %14 = vsyncpa [#allocation3], 0 }
   0x3   :  { %16 = vsyncpa [#allocation3 + $0x1], 0  ;;  %s1240_s30 = smov 0   ;;  %s1242_s10 = smov 0  }
   0x4   :  { %s1244_s11 = smov 0   ;;  %s1246_s12 = smov 0  }
   0x5 LB: > { %s1261_s13 = sadd.s32 4294967295, %s1188_s12   ;;  %s1004_s14 = sadd.s32 4294967294, %s1188_s12   ;;  %s1188_s12 = sphi %s1246_s12, %s1717_s12   ;;  %s1184_s11 = sphi %s1244_s11, %s1716_s11   ;;  %s1180_s10 = sphi %s1242_s10, %s1715_s10   ;;  %s1176_s30 = sphi %s1240_s30, %s1714_s30  }
   0x6   : > { %s1265_s15 = sadd.s32 1, %s1188_s12   ;;  %s263_s16 = sadd.s32 1, %s1184_s11 }
   0x7   : > { %s260_s17 = ssub.s32 %s1188_s12, %s1265_s15  ;;  %p273_p0 = scmp.ne.s32.totalorder %s1184_s11, %s1180_s10 }
   0x8   : > { %p261_p1 = scmp.eq.s32.totalorder %s260_s17, 0  ;;  %p274_p2 = scmp.eq.s32.totalorder %s1261_s13, 1 }
   0x9   : > { %p279_p3 = scmp.ne.s32.totalorder %s1180_s10, %s1176_s30  ;;  %p280_p4 = scmp.eq.s32.totalorder %s1004_s14, 1 }
   0xa   : > { %s1276_s18 = scalar_select %p261_p1, %s1184_s11, %s263_s16  }
   0xb   : > { %p1278_p5 = por %p274_p2, %p273_p0  ;;  %p1282_p6 = por %p280_p4, %p279_p3 }
   0xc   : > { %p1007_p7 = scmp.ge.s32.totalorder %s1188_s12, 1  ;;  %p379_p8 = scmp.lt.s32.totalorder %s1188_s12, 3 }
   0xe   : > { %p380_p9 = pnand %p1007_p7, %p379_p8 }
   0xf   : > { %s1008_s21 = sshll.u32 (!%p380_p9), %s1261_s13, 1  ;;  %s1683_s0 = sld [smem:[#allocation5_spill]] (!%p380_p9) }
  0x10   : > { %383 = sbr.rel (%p380_p9) target bundleno = 291 (0x123), region = 56  ;;  %p455_p10 = scmp.lt.s32.totalorder (!%p380_p9), %s1008_s21, 3 }
  0x15   : > { %s1719_s21 = smov (!%p455_p10, %s1008_s21), 3 }
  0x16   : > { %s1289_s22 = sshll.u32 %s1719_s21, 3 }
  0x17   : > { %s464_s25 = scalar_lea.vmem %s1671_s1, %s1289_s22  ;;  %s458_s28 = scalar_lea.vmem %s1683_s0, %s1289_s22 }
  0x18   : > { %v1295_v0 = vld [vmem:[%s464_s25] sm:$0xff]  ;;  %v1301_v1 = vld [vmem:[%s464_s25 + $0x8] sm:$0xff]  ;;  %s470_s16 = scalar_lea.vmem %s1672_s2, %s1289_s22  ;;  %s476_s23 = scalar_lea.vmem %s1673_s3, %s1289_s22 }
  0x19   : > { %v558_v2 = vand.u32 2147483647, %v1295_v0  ;;  %v512_v3 = vld [vmem:[%s458_s28] sm:$0xff]  ;;  %v1308_v4 = vld [vmem:[%s458_s28 + $0x8] sm:$0xff]  ;;  %v559_v5 = vand.u32 2147483647, %v1301_v1  ;;  %s500_s26 = scalar_lea.vmem %s1677_s7, %s1289_s22  ;;  %s506_s29 = scalar_lea.vmem %s1678_s8, %s1289_s22 }
  0x1a   : > { %v518_v6 = vand.u32 2147483647, %v512_v3  ;;  %v519_v8 = vand.u32 2147483647, %v1308_v4  ;;  %v1312_v9 = vld [vmem:[%s470_s16] sm:$0xff]  ;;  %v1314_v10 = vld [vmem:[%s470_s16 + $0x8] sm:$0xff]  ;;  %s482_s17 = scalar_lea.vmem %s1674_s4, %s1289_s22  ;;  %s488_s24 = scalar_lea.vmem %s1675_s5, %s1289_s22 }
  0x1b   : > { %v560_v7 = vsub.f32 0.0, %v558_v2  ;;  %v561_v11 = vsub.f32 0.0, %v559_v5  ;;  %v604_v14 = vand.u32 2147483647, %v1312_v9  ;;  %v605_v16 = vand.u32 2147483647, %v1314_v10  ;;  %s494_s27 = scalar_lea.vmem %s1676_s6, %s1289_s22  ;;  %s849_s16 = scalar_lea.hbm %s1679_s9, %s1261_s13 }
  0x1c   : > { %v520_v12 = vsub.f32 0.0, %v518_v6  ;;  %v521_v15 = vsub.f32 0.0, %v519_v8  ;;  %v1326_v20 = vld [vmem:[%s476_s23] sm:$0xff]  ;;  %v514_v23 = vsub.f32 0.0, %v512_v3  ;;  %v1332_v26 = vld [vmem:[%s476_s23 + $0x8] sm:$0xff]  ;;  %v515_v28 = vsub.f32 0.0, %v1308_v4 }
  0x1d   : > { %v562_v13 = vmul.f32 1.442695, %v560_v7  ;;  %v564_v17 = vmul.f32 1.442695, %v561_v11  ;;  %v606_v18 = vsub.f32 0.0, %v604_v14  ;;  %v607_v22 = vsub.f32 0.0, %v605_v16 }
  0x1e   : > { %v522_v19 = vmul.f32 1.442695, %v520_v12  ;;  %v524_v21 = vmul.f32 1.442695, %v521_v15  ;;  %v508_v24 = vld [vmem:[%s500_s26] sm:$0xff]  ;;  %v511_v30 = vld [vmem:[%s506_s29 + $0x8] sm:$0xff] }
  0x1f   : > { %1070 = vpow2.f32 %v562_v13  ;;  %v608_v25 = vmul.f32 1.442695, %v606_v18  ;;  %v646_v27 = vand.u32 2147483647, %v1326_v20  ;;  %v510_v29 = vld [vmem:[%s506_s29] sm:$0xff]  ;;  %v554_v31 = vsub.f32 0.0, %v1295_v0 }
  0x20   : > { %1072 = vpow2.f32 %v564_v17  ;;  %v610_v32 = vmul.f32 1.442695, %v607_v22  ;;  %v1339_v34 = vmax.f32 %v514_v23, 0.0  ;;  %v546_v35 = vsub.f32 1.0, %v508_v24  ;;  %v1343_v38 = vld [vmem:[%s500_s26 + $0x8] sm:$0xff]  ;;  %v1398_v8 = vld [vmem:[%s482_s17] sm:$0xff] }
  0x21   : > { %1074 = vpow2.f32 %v522_v19  ;;  %v555_v36 = vsub.f32 0.0, %v1301_v1  ;;  %v647_v37 = vand.u32 2147483647, %v1332_v26  ;;  %v1345_v39 = vsub.f32 1.0, %v510_v29  ;;  %v1408_v15 = vld [vmem:[%s482_s17 + $0x8] sm:$0xff]  ;;  %s1026_s22 = sshll.u32 %s1261_s13, 4 }
  0x22   : > { %1076 = vpow2.f32 %v524_v21  ;;  %v1347_v40 = vsub.f32 1.0, %v511_v30  ;;  %v648_v41 = vsub.f32 0.0, %v646_v27  ;;  %v1349_v42 = vmax.f32 %v515_v28, 0.0  ;;  %s452_s28 = sand.u32 1, %s1180_s10   ;;  %s853_s23 = sshll.u32 %s849_s16, 4  ;;  %s854_s23 = int_to_ptr.hbm [resolvable:$true] %s853_s23 }
  0x23   : > { %1078 = vpow2.f32 %v608_v25  ;;  %v590_v43 = vmul.f32 -0.04, %v510_v29  ;;  %v591_v44 = vmul.f32 -0.04, %v511_v30  ;;  %v649_v45 = vsub.f32 0.0, %v647_v37  ;;  %s453_s17 = scalar_lea.vmem [#allocation2], %s452_s28 }
  0x24   : > { %v600_v48 = vsub.f32 0.0, %v1312_v9  ;;  %v601_v49 = vsub.f32 0.0, %v1314_v10  ;;  %1080 = vpow2.f32 %v610_v32  ;;  %v1359_v52 = vmul.f32 %v546_v35, %v512_v3  ;;  %s851_s21 = sshll.u32 %s453_s17, 4  ;;  %s841_s25 = scalar_lea.sflag [#allocation3], %s452_s28  ;;  %s852_s21 = int_to_ptr.vmem [resolvable:$true] %s851_s21 }
  0x25   : > { %v1337_v33 = vpop.eup %1070  ;;  %v1361_v53 = vmax.f32 %v554_v31, 0.0  ;;  %v650_v54 = vmul.f32 1.442695, %v648_v41  ;;  %v1369_v56 = vmax.f32 %v555_v36, 0.0  ;;  %v1373_v57 = vmul.f32 %v1345_v39, %v1295_v0  ;;  %s1140_s26 = sshra.s32 %s854_s23, 4  ;;  %s1146_s13 = scalar_lea.hbm %s1679_s9, 2  ;;  %s1141_s26 = int_to_ptr.hbm [resolvable:$true] %s1140_s26 }
  0x26   : > { %v1351_v46 = vpop.eup %1072  ;;  %v566_v47 = vadd.f32 1.0, %v1337_v33  ;;  %v1377_v58 = vmul.f32 %v1347_v40, %v1301_v1  ;;  %v652_v59 = vmul.f32 1.442695, %v649_v45  ;;  %v1382_v63 = vadd.f32 1.0, %v590_v43  ;;  %p1147_p0 = scmp.lt.s32.totalorder %s1141_s26, %s1679_s9 }
  0x27   : > { %v1356_v50 = vpop.eup %1074  ;;  %v575_v62 = vadd.f32 1.0, %v1351_v46  ;;  %v1386_v3 = vadd.f32 1.0, %v591_v44  ;;  %v1388_v0 = vmax.f32 %v600_v48, 0.0  ;;  %v1390_v5 = vmax.f32 %v601_v49, 0.0 }
  0x28   : > { %v1363_v55 = vpop.eup %1076  ;;  %v529_v60 = vmul.f32 -0.5, %v1356_v50  ;;  %1082 = vlog2.f32 %v566_v47  ;;  %v526_v1 = vadd.f32 1.0, %v1356_v50  ;;  %v569_v6 = vmul.f32 -0.5, %v1337_v33 }
  0x29   : > { %v538_v61 = vmul.f32 -0.5, %v1363_v55  ;;  %v1384_v2 = vpop.eup %1078  ;;  %v1396_v7 = vmul.f32 %v1312_v9, %v1345_v39  ;;  %1084 = vpow2.f32 %v650_v54  ;;  %v535_v12 = vadd.f32 1.0, %v1363_v55  ;;  %v1444_v54 = vld [vmem:[%s488_s24] sm:$0xff] }
  0x2a   : > { %v1400_v11 = vpop.eup %1080  ;;  %v1405_v13 = vmul.f32 %v1314_v10, %v1347_v40  ;;  %v642_v14 = vsub.f32 0.0, %v1326_v20  ;;  %1086 = vpow2.f32 %v652_v59  ;;  %v530_v16 = vadd.f32 1.0, %v529_v60  ;;  %v1446_v59 = vld [vmem:[%s488_s24 + $0x8] sm:$0xff] }
  0x2b   : > { %v539_v9 = vadd.f32 1.0, %v538_v61  ;;  %1088 = vlog2.f32 %v575_v62  ;;  %v612_v17 = vadd.f32 1.0, %v1384_v2  ;;  %v572_v18 = vand.u32 2147483647, %v1337_v33 }
  0x2c   : > { %v578_v19 = vmul.f32 -0.5, %v1351_v46  ;;  %v643_v21 = vsub.f32 0.0, %v1332_v26  ;;  %v688_v10 = vand.u32 2147483647, %v1398_v8  ;;  %1090 = vlog2.f32 %v526_v1 }
  0x2d   : > { %v570_v22 = vadd.f32 1.0, %v569_v6  ;;  %v621_v23 = vadd.f32 1.0, %v1400_v11  ;;  %v689_v24 = vand.u32 2147483647, %v1408_v15  ;;  %v532_v27 = vand.u32 2147483647, %v1356_v50 }
  0x2e   : > { %v1083_v25 = vpop.eup %1082  ;;  %1092 = vlog2.f32 %v535_v12  ;;  %v1423_v29 = vmax.f32 %v642_v14, 0.0  ;;  %v1428_v31 = vmul.f32 %v1356_v50, %v530_v16  ;;  %v1431_v32 = vmul.f32 %v1363_v55, %v539_v9 }
  0x2f   : > { %v1425_v30 = vpop.eup %1084  ;;  %v581_v35 = vand.u32 2147483647, %v1351_v46  ;;  %1094 = vlog2.f32 %v612_v17  ;;  %vm1436_vm0 = vcmp.lt.f32.partialorder %v572_v18, 0.0004427343  ;;  %v579_v41 = vadd.f32 1.0, %v578_v19 }
  0x30   : > { %v1434_v36 = vpop.eup %1086  ;;  %v615_v43 = vmul.f32 -0.5, %v1384_v2  ;;  %v690_v44 = vsub.f32 0.0, %v688_v10  ;;  %v571_v47 = vmul.f32 %v1337_v33, %v570_v22  ;;  %1096 = vlog2.f32 %v621_v23 }
  0x31   : > { %v1089_v45 = vpop.eup %1088  ;;  %v1442_v48 = vmax.f32 %v643_v21, 0.0  ;;  %v691_v49 = vsub.f32 0.0, %v689_v24  ;;  %v568_v60 = vmul.f32 0.6931472, %v1083_v25  ;;  %v624_v61 = vmul.f32 -0.5, %v1400_v11 }
  0x32   : > { %v654_v62 = vadd.f32 1.0, %v1425_v30  ;;  %v692_v1 = vmul.f32 1.442695, %v690_v44  ;;  %v1091_v6 = vpop.eup %1090  ;;  %vm1450_vm1 = vcmp.lt.f32.partialorder %v581_v35, 0.0004427343  ;;  %v663_v33 = vadd.f32 1.0, %v1434_v36 }
  0x33   : > { %v1457_v14 = vmul.f32 %v1326_v20, %v1345_v39  ;;  %v694_v16 = vmul.f32 1.442695, %v691_v49  ;;  %v577_v17 = vmul.f32 0.6931472, %v1089_v45  ;;  %v580_v18 = vmul.f32 %v1351_v46, %v579_v41 }
  0x34   : > { %v1459_v9 = vpop.eup %1092  ;;  %v616_v19 = vadd.f32 1.0, %v615_v43  ;;  %1098 = vpow2.f32 %v692_v1  ;;  %v618_v10 = vand.u32 2147483647, %v1384_v2  ;;  %v730_v22 = vand.u32 2147483647, %v1444_v54 }
  0x35   : > { %v1095_v21 = vpop.eup %1094  ;;  %1100 = vpow2.f32 %v694_v16  ;;  %v731_v23 = vand.u32 2147483647, %v1446_v59  ;;  %v574_v20 = vsel %vm1436_vm0, %v571_v47, %v568_v60  ;;  %v625_v24 = vadd.f32 1.0, %v624_v61 }
  0x36   : > { %v627_v25 = vand.u32 2147483647, %v1400_v11  ;;  %1102 = vlog2.f32 %v654_v62  ;;  %v1097_v35 = vpop.eup %1096  ;;  %v657_v46 = vmul.f32 -0.5, %v1425_v30  ;;  %v666_v41 = vmul.f32 -0.5, %v1434_v36 }
  0x37   : > { %1104 = vlog2.f32 %v663_v33  ;;  %v732_v43 = vsub.f32 0.0, %v730_v22  ;;  %v1470_v44 = vmul.f32 0.6931472, %v1091_v6  ;;  %v614_v45 = vmul.f32 0.6931472, %v1095_v21 }
  0x38   : > { %v617_v49 = vmul.f32 %v1384_v2, %v616_v19  ;;  %v733_v1 = vsub.f32 0.0, %v731_v23  ;;  %v583_v37 = vsel %vm1450_vm1, %v580_v18, %v577_v17  ;;  %v584_v47 = vadd.f32 %v574_v20, %v1361_v53 }
  0x39   : > { %vm1476_vm2 = vcmp.lt.f32.partialorder %v618_v10, 0.0004427343  ;;  %v1482_v61 = vmul.f32 %v1332_v26, %v1347_v40  ;;  %v623_v6 = vmul.f32 0.6931472, %v1097_v35  ;;  %v626_v33 = vmul.f32 %v1400_v11, %v625_v24 }
  0x3a   : > { %v1484_v62 = vpop.eup %1098  ;;  %vm1487_vm3 = vcmp.lt.f32.partialorder %v627_v25, 0.0004427343  ;;  %v660_v12 = vand.u32 2147483647, %v1425_v30  ;;  %v658_v16 = vadd.f32 1.0, %v657_v46  ;;  %v667_v26 = vadd.f32 1.0, %v666_v41 }
  0x3b   : > { %v1492_v53 = vpop.eup %1100  ;;  %v696_v17 = vadd.f32 1.0, %v1484_v62  ;;  %v734_v18 = vmul.f32 1.442695, %v732_v43  ;;  %v620_v11 = vsel %vm1476_vm2, %v617_v49, %v614_v45  ;;  %v684_v21 = vsub.f32 0.0, %v1398_v8  ;;  %v1513_v43 = vld [vmem:[%s494_s27] sm:$0xff]  ;;  %v1515_v45 = vld [vmem:[%s494_s27 + $0x8] sm:$0xff] }
  0x3c   : > { %v1103_v19 = vpop.eup %1102  ;;  %v705_v10 = vadd.f32 1.0, %v1492_v53  ;;  %v736_v22 = vmul.f32 1.442695, %v733_v1  ;;  %v585_v20 = vadd.f32 %v583_v37, %v1369_v56  ;;  %v594_v24 = vmul.f32 %v1382_v63, %v584_v47  ;;  %s1142_s27 = scalar_lea.hbm %s1141_s26, 1 }
  0x3d   : > { %v1105_v23 = vpop.eup %1104  ;;  %v685_v25 = vsub.f32 0.0, %v1408_v15  ;;  %1106 = vlog2.f32 %v696_v17  ;;  %v629_v35 = vsel %vm1487_vm3, %v626_v33, %v623_v6  ;;  %vm1508_vm4 = vcmp.lt.f32.partialorder %v660_v12, 0.0004427343  ;;  %p1143_p11 = scmp.ne.s32.totalorder %s1141_s26, %s1142_s27  ;;  %p1148_p1 = scmp.lt.s32.totalorder %s1146_s13, %s1142_s27 }
  0x3e   : > { %v669_v41 = vand.u32 2147483647, %v1434_v36  ;;  %1108 = vlog2.f32 %v705_v10  ;;  %v630_v56 = vadd.f32 %v620_v11, %v1388_v0  ;;  %v659_v49 = vmul.f32 %v1425_v30, %v658_v16 }
  0x3f   : > { %v668_v1 = vmul.f32 %v1434_v36, %v667_v26  ;;  %1110 = vpow2.f32 %v734_v18  ;;  %v656_v37 = vmul.f32 0.6931472, %v1103_v19  ;;  %v665_v47 = vmul.f32 0.6931472, %v1105_v23  ;;  %p1144_p12 = pnand %p1143_p11, %p1278_p5  ;;  %p1149_p2 = por %p1148_p1, %p1147_p0 }
  0x40   : > { %v699_v60 = vmul.f32 -0.5, %v1484_v62  ;;  %1112 = vpow2.f32 %v736_v22  ;;  %v631_v6 = vadd.f32 %v629_v35, %v1390_v5  ;;  %v708_v33 = vmul.f32 -0.5, %v1492_v53 }
  0x41   : > { %v772_v2 = vand.u32 2147483647, %v1513_v43  ;;  %v773_v12 = vand.u32 2147483647, %v1515_v45  ;;  %v1526_v0 = vmul.f32 0.6931472, %v1459_v9  ;;  %v595_v30 = vmul.f32 %v1386_v3, %v585_v20  ;;  %p1145_p13 = pneg %p1144_p12 }
  0x42   : > { %vm1529_vm5 = vcmp.lt.f32.partialorder %v669_v41, 0.0004427343  ;;  %v686_v16 = vmax.f32 %v684_v21, 0.0  ;;  %v596_v17 = vadd.f32 %v594_v24, %v1373_v57  ;;  %v687_v5 = vmax.f32 %v685_v25, 0.0 }
  0x43   : > { %v1107_v26 = vpop.eup %1106  ;;  %v774_v18 = vsub.f32 0.0, %v772_v2  ;;  %v775_v19 = vsub.f32 0.0, %v773_v12  ;;  %v662_v10 = vsel %vm1508_vm4, %v659_v49, %v656_v37  ;;  %v700_v22 = vadd.f32 1.0, %v699_v60  ;;  %p1150_p3 = pnand %p1149_p2, %p1145_p13 }
  0x44   : > { %v1109_v11 = vpop.eup %1108  ;;  %v702_v9 = vand.u32 2147483647, %v1484_v62  ;;  %v726_v23 = vsub.f32 0.0, %v1444_v54  ;;  %v634_v35 = vmul.f32 %v630_v56, %v1382_v63  ;;  %v635_v21 = vmul.f32 %v631_v6, %v1386_v3 }
  0x45   : > { %v1111_v20 = vpop.eup %1110  ;;  %v671_v57 = vsel %vm1529_vm5, %v668_v1, %v665_v47  ;;  %v709_v24 = vadd.f32 1.0, %v708_v33  ;;  %v711_v41 = vand.u32 2147483647, %v1492_v53  ;;  %v776_v49 = vmul.f32 1.442695, %v774_v18 }
  0x46   : > { %v1113_v25 = vpop.eup %1112  ;;  %v738_v2 = vadd.f32 1.0, %v1111_v20  ;;  %v741_v46 = vmul.f32 -0.5, %v1111_v20  ;;  %v672_v37 = vadd.f32 %v662_v10, %v1423_v29  ;;  %v778_v51 = vmul.f32 1.442695, %v775_v19 }
  0x47   : > { %v747_v60 = vadd.f32 1.0, %v1113_v25  ;;  %v750_v12 = vmul.f32 -0.5, %v1113_v25  ;;  %v698_v28 = vmul.f32 0.6931472, %v1107_v26  ;;  %v701_v56 = vmul.f32 %v1484_v62, %v700_v22 }
  0x48   : > { %vm1545_vm6 = vcmp.lt.f32.partialorder %v702_v9, 0.0004427343  ;;  %1114 = vlog2.f32 %v738_v2  ;;  %v707_v1 = vmul.f32 0.6931472, %v1109_v11  ;;  %v710_v47 = vmul.f32 %v1492_v53, %v709_v24 }
  0x49   : > { %v742_v33 = vadd.f32 1.0, %v741_v46  ;;  %1116 = vlog2.f32 %v747_v60  ;;  %vm1550_vm7 = vcmp.lt.f32.partialorder %v711_v41, 0.0004427343  ;;  %v744_v29 = vand.u32 2147483647, %v1111_v20 }
  0x4a   : > { %v751_v18 = vadd.f32 1.0, %v750_v12  ;;  %1118 = vpow2.f32 %v776_v49  ;;  %vm1556_vm8 = vcmp.lt.f32.partialorder %v532_v27, 0.0004427343  ;;  %v597_v26 = vadd.f32 %v595_v30, %v1377_v58 }
  0x4b   : > { %v673_v19 = vadd.f32 %v671_v57, %v1442_v48  ;;  %v753_v53 = vand.u32 2147483647, %v1113_v25  ;;  %1120 = vpow2.f32 %v778_v51  ;;  %v636_v11 = vadd.f32 %v634_v35, %v1396_v7 }
  0x4c   : > { %v704_v10 = vsel %vm1545_vm6, %v701_v56, %v698_v28  ;;  %v716_v22 = vmul.f32 %v1398_v8, %v1345_v39  ;;  %v727_v50 = vsub.f32 0.0, %v1446_v59  ;;  %v637_v27 = vadd.f32 %v635_v21, %v1405_v13 }
  0x4d   : > { %v713_v9 = vsel %vm1550_vm7, %v710_v47, %v707_v1  ;;  %v717_v58 = vmul.f32 %v1408_v15, %v1347_v40  ;;  %v743_v48 = vmul.f32 %v1111_v20, %v742_v33  ;;  %v676_v7 = vmul.f32 %v672_v37, %v1382_v63 }
  0x4e   : > { %v1115_v51 = vpop.eup %1114  ;;  %v728_v30 = vmax.f32 %v726_v23, 0.0  ;;  %vm1574_vm9 = vcmp.lt.f32.partialorder %v744_v29, 0.0004427343  ;;  %v752_v8 = vmul.f32 %v1113_v25, %v751_v18  ;;  %v1704_v57 = vand.u32 2147483647, %v1363_v55 }
  0x4f   : > { %v1117_v35 = vpop.eup %1116  ;;  %v677_v21 = vmul.f32 %v673_v19, %v1386_v3  ;;  %v714_v15 = vadd.f32 %v704_v10, %v686_v16  ;;  %v740_v20 = vmul.f32 0.6931472, %v1115_v51  ;;  %vm1585_vm11 = vcmp.lt.f32.partialorder %v753_v53, 0.0004427343 }
  0x50   : > { %vm1580_vm10 = vcmp.lt.f32.partialorder %v1704_v57, 0.0004427343  ;;  %v1119_v23 = vpop.eup %1118  ;;  %v638_v41 = vadd.f32 %v636_v11, %v596_v17  ;;  %v715_v2 = vadd.f32 %v713_v9, %v687_v5  ;;  %v729_v46 = vmax.f32 %v727_v50, 0.0 }
  0x51   : > { %v749_v25 = vmul.f32 0.6931472, %v1117_v35  ;;  %v1121_v49 = vpop.eup %1120  ;;  %v639_v37 = vadd.f32 %v637_v27, %v597_v26  ;;  %v746_v55 = vsel %vm1574_vm9, %v743_v48, %v740_v20  ;;  %v780_v60 = vadd.f32 1.0, %v1119_v23 }
  0x52   : > { %v783_v12 = vmul.f32 -0.5, %v1119_v23  ;;  %v678_v56 = vadd.f32 %v676_v7, %v1457_v14  ;;  %v789_v6 = vadd.f32 1.0, %v1121_v49  ;;  %v792_v1 = vmul.f32 -0.5, %v1121_v49 }
  0x53   : > { %v755_v16 = vsel %vm1585_vm11, %v752_v8, %v749_v25  ;;  %v679_v47 = vadd.f32 %v677_v21, %v1482_v61  ;;  %v718_v17 = vmul.f32 %v714_v15, %v1382_v63  ;;  %v756_v5 = vadd.f32 %v746_v55, %v728_v30 }
  0x54   : > { %1122 = vlog2.f32 %v780_v60  ;;  %v719_v33 = vmul.f32 %v715_v2, %v1386_v3  ;;  %v757_v36 = vadd.f32 %v755_v16, %v729_v46  ;;  %v784_v29 = vadd.f32 1.0, %v783_v12 }
  0x55   : > { %1124 = vlog2.f32 %v789_v6  ;;  %v768_v18 = vsub.f32 0.0, %v1513_v43  ;;  %v786_v26 = vand.u32 2147483647, %v1119_v23  ;;  %v793_v14 = vadd.f32 1.0, %v792_v1 }
  0x56   : > { %v810_v19 = vlaneseq  ;;  %v534_v53 = vsel %vm1556_vm8, %v1428_v31, %v1470_v44  ;;  %v758_v61 = vmul.f32 %v1444_v54, %v1345_v39  ;;  %v769_v11 = vsub.f32 0.0, %v1515_v45 }
  0x57   : > { %v795_v10 = vand.u32 2147483647, %v1121_v49  ;;  %v680_v50 = vadd.f32 %v678_v56, %v638_v41  ;;  %v720_v27 = vadd.f32 %v718_v17, %v716_v22  ;;  %v759_v9 = vmul.f32 %v1446_v59, %v1347_v40 }
  0x58   : > { %v760_v48 = vmul.f32 %v756_v5, %v1382_v63  ;;  %v681_v51 = vadd.f32 %v679_v47, %v639_v37  ;;  %v721_v7 = vadd.f32 %v719_v33, %v717_v58  ;;  %v761_v30 = vmul.f32 %v757_v36, %v1386_v3 }
  0x59   : > { %v785_v62 = vmul.f32 %v1119_v23, %v784_v29  ;;  %v770_v44 = vmax.f32 %v768_v18, 0.0  ;;  %vm1609_vm12 = vcmp.lt.f32.partialorder %v786_v26, 0.0004427343  ;;  %v794_v28 = vmul.f32 %v1121_v49, %v793_v14 }
  0x5a   : > { %v1123_v31 = vpop.eup %1122  ;;  %v811_v8 = vshrl.u32 %v810_v19, 7  ;;  %v543_v59 = vsel %vm1580_vm10, %v1431_v32, %v1526_v0  ;;  %v771_v35 = vmax.f32 %v769_v11, 0.0  ;;  %vm1617_vm13 = vcmp.lt.f32.partialorder %v795_v10, 0.0004427343 }
  0x5b   : > { %v1125_v22 = vpop.eup %1124  ;;  %v782_v57 = vmul.f32 0.6931472, %v1123_v31  ;;  %v544_v21 = vadd.f32 %v534_v53, %v1339_v34  ;;  %v722_v15 = vadd.f32 %v720_v27, %v680_v50  ;;  %v762_v20 = vadd.f32 %v760_v48, %v758_v61 }
  0x5c   : > { %v791_v24 = vmul.f32 0.6931472, %v1125_v22  ;;  %v723_v23 = vadd.f32 %v721_v7, %v681_v51  ;;  %v763_v41 = vadd.f32 %v761_v30, %v759_v9  ;;  %v800_v32 = vmul.f32 %v1513_v43, %v1345_v39 }
  0x5d   : > { %v788_v2 = vsel %vm1609_vm12, %v785_v62, %v782_v57  ;;  %v812_v46 = vadd.s32 8, %v811_v8  ;;  %v814_v25 = vstv %s1026_s22  ;;  %v545_v49 = vadd.f32 %v543_v59, %v1349_v42 }
  0x5e   : > { %v797_v0 = vsel %vm1617_vm13, %v794_v28, %v791_v24  ;;  %v798_v13 = vadd.f32 %v788_v2, %v770_v44  ;;  %v1713_v34 = vsub.f32 1.0, %v1343_v38  ;;  %v801_v60 = vmul.f32 %v1515_v45, %v1347_v40 }
  0x5f   : > { %v799_v55 = vadd.f32 %v797_v0, %v771_v35  ;;  %v764_v12 = vadd.f32 %v762_v20, %v722_v15  ;;  %v765_v39 = vadd.f32 %v763_v41, %v723_v23  ;;  %v815_v16 = vadd.s32 %v814_v25, %v811_v8 }
  0x60   : > { %v549_v37 = vmul.f32 %v1713_v34, %v1308_v4  ;;  %v802_v56 = vmul.f32 %v798_v13, %v1382_v63  ;;  %v550_v6 = vadd.f32 %v1359_v52, %v544_v21  ;;  %v816_v47 = vadd.s32 %v814_v25, %v812_v46 }
  0x61   : > { %v803_v43 = vmul.f32 %v799_v55, %v1386_v3  ;;  %vm817_vm14 = vcmp.lt.s32.totalorder %v815_v16, 32  ;;  %vm825_vm0 = vcmask 130048  }
  0x62   : > { %v804_v1 = vadd.f32 %v802_v56, %v800_v32  ;;  %v551_v42 = vadd.f32 %v549_v37, %v545_v49  ;;  %vm818_vm15 = vcmp.lt.s32.totalorder %v816_v47, 32 }
  0x63   : > { %v805_v17 = vadd.f32 %v803_v43, %v801_v60 }
  0x64   : > { %v806_v5 = vadd.f32 %v804_v1, %v764_v12 }
  0x65   : > { %v807_v38 = vadd.f32 %v805_v17, %v765_v39 }
  0x66   : > { %v808_v4 = vadd.f32 %v806_v5, %v550_v6 }
  0x67   : > { %v809_v40 = vadd.f32 %v807_v38, %v551_v42 }
  0x68   : > { %v823_v63 = vsel %vm817_vm14, %v808_v4, 0.0 }
  0x69   : > { %v824_v45 = vsel %vm818_vm15, %v809_v40, 0.0  ;;  %v826_v33 = vsel %vm825_vm0, %v823_v63, 0.0 }
  0x6a   : > { %v827_v3 = vsel %vm825_vm0, %v824_v45, 0.0 }
  0x6b   : > { %v828_v36 = vadd.f32 %v827_v3, %v826_v33 }
  0x6d   : > { %829 = vadd.xlane.f32.xlu0 %v828_v36 }
  0xe0   : > { %v830_v52 = vpop.xlane.xlu0 %829 }
  0xe1   : > { %v831_v29 = vrot.slane %v830_v52, 4 }
  0xe3   : > { %v832_v18 = vadd.f32 %v831_v29, %v830_v52 }
  0xe5   : > { %v833_v26 = vrot.slane %v832_v18, 2 }
  0xe7   : > { %v834_v14 = vadd.f32 %v833_v26, %v832_v18 }
  0xe9   : > { %v835_v19 = vrot.slane %v834_v14, 1 }
  0xeb   : > { %v836_v53 = vadd.f32 %v835_v19, %v834_v14 }
  0xed   : > { %1029 = vpush %v836_v53 }
 0x11e   : > { %s1030_s24 = spop %1029 }
 0x11f   : > { %v838_v61 = vstv %s1030_s24 }
 0x120   : > { %839 = vst [vmem:[%s453_s17] sm:$0x1] %v838_v61 }
 0x121   : > { %1153 = shalt.err (!%p1150_p3)
}
 0x122   : > { %1031 = dma.vmem_to_hbm [thread:$0]  (%p1278_p5), %s852_s21, 16, %s854_s23, %s841_s25  }
 0x123 PF: > { %p1037_p4 = scmp.ge.s32.totalorder %s1188_s12, 2  ;;  %s865_s28 = sand.u32 1, %s1176_s30  }
 0x124   : > { %s866_s0 = scalar_lea.sflag [#allocation3], %s865_s28 }
 0x125   : > { %p1034_p7 = pnand %p1037_p4, %p1282_p6 }
 0x127   : > { %p1035_p8 = pneg %p1034_p7 }
 0x129   : > { %1171 = dma.done.wait (%p1035_p8), %s866_s0, 16  }
 0x12a   : > { %1173 = vsyncadd (%p1035_p8), %s866_s0, 4294967280  ;;  %p19_p9 = scmp.ge.s32.totalorder %s1265_s15, 4   ;;  %s1714_s30 = smov %s1180_s10 }
 0x12b   : > { %s1715_s10 = smov %s1184_s11  ;;  %s1716_s11 = smov %s1276_s18 }
 0x12c   : > { %s1717_s12 = smov %s1265_s15  ;;  %21 = sbr.rel (!%p19_p9) target bundleno = 5 (0x5), region = 115 }
 0x131   :  { %871 = vsyncpa [#allocation3], 1 }
 0x132   :  { %873 = vsyncpa [#allocation3 + $0x1], 1 }

</bundles_post_ra>
